<compile_context>
chip_gen: v7x
topology: tpu7x:2x2x1
jax: 0.10.0
libtpu: 0.0.40
codegen_flags: <defaults>
</compile_context>

<pallas_src>
import math
import jax
import jax.numpy as jnp
from jax.experimental import pallas as pl
from jax.experimental.pallas import tpu as pltpu


def _gcn_kernel(x_ref, w_ref, att_ref, b_ref, o_ref):
    # x_ref   : (N, B*Fin)    node-major, batch packed into lanes
    # w_ref   : (B*Fin, B*Fout)  block-diagonal weight
    # att_ref : (N, N)
    # b_ref   : (1, B*Fout)   bias tiled across the batch
    # o_ref   : (N, B*Fout)
    support = jnp.dot(x_ref[...], w_ref[...],
                      preferred_element_type=jnp.float32)      # (N, B*Fout)
    out = jnp.dot(att_ref[...], support,
                  preferred_element_type=jnp.float32)          # (N, B*Fout)
    # One broadcast, one full lane-dense store.
    o_ref[...] = (out + b_ref[...]).astype(o_ref.dtype)


def graph_convolution(x, weight, att, bias):
    """x: (B, N, Fin) f32; weight: (Fin, Fout); att: (N, N); bias: (Fout,)."""
    B, N, Fin = x.shape
    Fin_w, Fout = weight.shape
    assert Fin == Fin_w, "weight in_features mismatch"
    assert att.shape == (N, N), "att must be (node_n, node_n)"
    assert N % 8 == 0, "node_n must be a multiple of 8 (sublane alignment)"

    # Pack the batch into lanes: (B, N, Fin) -> (N, B*Fin).
    x_nb = jnp.transpose(x, (1, 0, 2)).reshape(N, B * Fin)
    # Block-diagonal weight so one matmul computes every batch's support.
    w_bd = jnp.kron(jnp.eye(B, dtype=weight.dtype), weight)     # (B*Fin, B*Fout)
    # Bias tiled once across the batch-packed feature axis.
    bias_nb = jnp.tile(bias, (B,)).reshape(1, B * Fout)         # (1, B*Fout)

    flops = 2 * N * (B * Fin) * (B * Fout) + 2 * N * N * (B * Fout)
    bytes_accessed = 4 * (x_nb.size + w_bd.size + att.size +
                          bias_nb.size + N * B * Fout)

    out_nb = pl.pallas_call(
        _gcn_kernel,
        out_shape=jax.ShapeDtypeStruct((N, B * Fout), x.dtype),
        # Single invocation, whole arrays resident in VMEM — nothing to tile
        # or multi-buffer at this working-set size (~50 KiB total).
        in_specs=[
            pl.BlockSpec(memory_space=pltpu.MemorySpace.VMEM),  # x_nb
            pl.BlockSpec(memory_space=pltpu.MemorySpace.VMEM),  # w_bd
            pl.BlockSpec(memory_space=pltpu.MemorySpace.VMEM),  # att
            pl.BlockSpec(memory_space=pltpu.MemorySpace.VMEM),  # bias_nb
        ],
        out_specs=pl.BlockSpec(memory_space=pltpu.MemorySpace.VMEM),
        cost_estimate=pl.CostEstimate(flops=flops,
                                      transcendentals=0,
                                      bytes_accessed=bytes_accessed),
    )(x_nb, w_bd, att, bias_nb)

    # (N, B*Fout) -> (B, N, Fout); column block b holds batch element b.
    return jnp.transpose(out_nb.reshape(N, B, Fout), (1, 0, 2))


if __name__ == "__main__":
    # Module config (mirrors GraphConvolution(in_features, out_features, node_n))
    in_features = 32
    out_features = 32
    node_n = 48
    batch = 2

    key = jax.random.PRNGKey(0)
    k_x, k_w, k_a, k_b = jax.random.split(key, 4)

    # Deterministic init mimicking reset_parameters(): uniform(-stdv, stdv)
    stdv = 1.0 / math.sqrt(out_features)
    weight = jax.random.uniform(k_w, (in_features, out_features),
                                minval=-stdv, maxval=stdv, dtype=jnp.float32)
    att = jax.random.uniform(k_a, (node_n, node_n),
                             minval=-stdv, maxval=stdv, dtype=jnp.float32)
    bias = jax.random.uniform(k_b, (out_features,),
                              minval=-stdv, maxval=stdv, dtype=jnp.float32)

    x = jax.random.normal(k_x, (batch, node_n, in_features), dtype=jnp.float32)

    out = graph_convolution(x, weight, att, bias)
    out = jax.block_until_ready(out)

    # Reference check in plain JAX (same semantics as the PyTorch forward)
    ref = jnp.matmul(att, jnp.matmul(x, weight)) + bias
    assert out.shape == (batch, node_n, out_features)
    assert jnp.allclose(out, ref, atol=1e-5, rtol=1e-5), "mismatch vs reference"

    print("KERNEL_OK")
</pallas_src>

<mosaic_0001>
module attributes {stable_mosaic.version = 11 : i64} {
  func.func @_gcn_kernel(%arg0: memref<48x64xf32, #tpu.memory_space<vmem>>, %arg1: memref<64x64xf32, #tpu.memory_space<vmem>>, %arg2: memref<48x48xf32, #tpu.memory_space<vmem>>, %arg3: memref<1x64xf32, #tpu.memory_space<vmem>>, %arg4: memref<48x64xf32, #tpu.memory_space<vmem>>) attributes {dimension_semantics = [], scalar_prefetch = 0 : i64, scratch_operands = 0 : i64, tpu.core_type = #tpu.core_type<tc>} {
    %c0 = arith.constant 0 : index
    %c0_0 = arith.constant 0 : index
    %0 = vector.load %arg0[%c0, %c0_0] : memref<48x64xf32, #tpu.memory_space<vmem>>, vector<48x64xf32>
    %c0_1 = arith.constant 0 : index
    %c0_2 = arith.constant 0 : index
    %1 = vector.load %arg1[%c0_1, %c0_2] : memref<64x64xf32, #tpu.memory_space<vmem>>, vector<64x64xf32>
    %cst = arith.constant dense<0.000000e+00> : vector<48x64xf32>
    %2 = tpu.matmul %0, %1, %cst {dimension_numbers = #tpu.dot_dimension_numbers<[1], [0], [0], [1], [0, 0, 1, 1], [], []>} : vector<48x64xf32>, vector<64x64xf32>, vector<48x64xf32> -> vector<48x64xf32>
    %c0_3 = arith.constant 0 : index
    %c0_4 = arith.constant 0 : index
    %3 = vector.load %arg2[%c0_3, %c0_4] : memref<48x48xf32, #tpu.memory_space<vmem>>, vector<48x48xf32>
    %cst_5 = arith.constant dense<0.000000e+00> : vector<48x64xf32>
    %4 = tpu.matmul %3, %2, %cst_5 {dimension_numbers = #tpu.dot_dimension_numbers<[1], [0], [0], [1], [0, 0, 1, 1], [], []>} : vector<48x48xf32>, vector<48x64xf32>, vector<48x64xf32> -> vector<48x64xf32>
    %c0_6 = arith.constant 0 : index
    %c0_7 = arith.constant 0 : index
    %5 = vector.load %arg3[%c0_6, %c0_7] : memref<1x64xf32, #tpu.memory_space<vmem>>, vector<1x64xf32>
    %6 = vector.broadcast %5 : vector<1x64xf32> to vector<48x64xf32>
    %7 = arith.addf %4, %6 : vector<48x64xf32>
    %c0_8 = arith.constant 0 : index
    %c0_9 = arith.constant 0 : index
    %8 = vector.load %arg4[%c0_8, %c0_9] : memref<48x64xf32, #tpu.memory_space<vmem>>, vector<48x64xf32>
    tpu.vector_store %arg4[%c0_8, %c0_9], %7 {strides = array<i32>} : memref<48x64xf32, #tpu.memory_space<vmem>>, vector<48x64xf32>,
    return
  }
}

</mosaic_0001>

<bundles_post_ra>
// kernel: tpu_custom_call.1
= control target key start
LH: loop header
LB: loop body
LE: loop exit
PB: predicated region body
PF: predicated region fallthrough
CT: control target
= control target key end

     0   :  { %9 = vsyncpa [#allocation3], 0  ;;  %s670_s0 = inlined_call_operand.hbm [shape: f32[48,64], index: 0, kind: input, shape index: {}]   ;;  %s671_s1 = inlined_call_operand.hbm [shape: f32[64,64], index: 1, kind: input, shape index: {}]   ;;  %s672_s2 = inlined_call_operand.hbm [shape: f32[48,48], index: 2, kind: input, shape index: {}]   ;;  %s673_s3 = inlined_call_operand.vmem [shape: f32[1,64], index: 3, kind: input, shape index: {}]   ;;  %s674_s4 = inlined_call_operand.hbm [shape: f32[48,64], index: 4, kind: output, shape index: {}]  }
   0x1   :  { %10 = vsyncpa [#allocation6], 0 }
   0x2   :  { %11 = vsyncpa [#allocation4], 0  ;;  %s551_s15 = smov [#allocation5]   ;;  %s552_s17 = smov [#allocation2]  }
   0x3   :  { %s29_s16 = sshll.u32 %s551_s15, 4  ;;  %s17_s18 = sshll.u32 %s552_s17, 4  ;;  %s30_s16 = int_to_ptr.vmem [resolvable:$true] %s29_s16  ;;  %s582_s18 = int_to_ptr.vmem [resolvable:$true] %s17_s18 }
   0x4   :  { %s457_s21 = scalar_lea.hbm %s671_s1, 1024 }
   0x5   :  { %p458_p0 = scmp.ne.s32.totalorder %s671_s1, %s457_s21  ;;  %p461_p1 = scmp.lt.u32.totalorder %s457_s21, %s671_s1 }
   0x7   :  { %p463_p2 = pnand %p461_p1, %p458_p0 }
   0x9   :  { %466 = shalt.err (!%p463_p2)
}
   0xa   :  { %s467_s26 = scalar_lea.vmem %s30_s16, 1024  ;;  %p472_p4 = scmp.lt.s32.totalorder %s30_s16, %s30_s16 }
   0xb   :  { %p468_p3 = scmp.ne.s32.totalorder %s30_s16, %s467_s26  ;;  %p473_p5 = scmp.lt.s32.totalorder %s467_s26, %s467_s26 }
   0xd   :  { %p474_p6 = por %p473_p5, %p472_p4 }
   0xf   :  { %p475_p7 = pnand %p474_p6, %p468_p3 }
  0x11   :  { %478 = shalt.err (!%p475_p7)
}
  0x12   :  { %s553_s27 = smov 128   ;;  %s554_s28 = smov 8  }
  0x13   :  { %35 = dma.hbm_to_vmem [thread:$0]  %s671_s1, 1024, %s30_s16, [#allocation6], %s553_s27, %s553_s27, %s554_s28  }
  0x14   :  { %s479_s7 = scalar_lea.hbm %s670_s0, 768 }
  0x15   :  { %p480_p8 = scmp.ne.s32.totalorder %s670_s0, %s479_s7  ;;  %p483_p9 = scmp.lt.u32.totalorder %s479_s7, %s670_s0 }
  0x17   :  { %p485_p10 = pnand %p483_p9, %p480_p8 }
  0x19   :  { %488 = shalt.err (!%p485_p10)
}
  0x1a   :  { %s489_s12 = scalar_lea.vmem %s582_s18, 768  ;;  %p494_p12 = scmp.lt.s32.totalorder %s582_s18, %s582_s18 }
  0x1b   :  { %p490_p11 = scmp.ne.s32.totalorder %s582_s18, %s489_s12  ;;  %p495_p13 = scmp.lt.s32.totalorder %s489_s12, %s489_s12 }
  0x1d   :  { %p496_p0 = por %p495_p13, %p494_p12 }
  0x1f   :  { %p497_p1 = pnand %p496_p0, %p490_p11 }
  0x21   :  { %500 = shalt.err (!%p497_p1)
}
  0x22   :  { %23 = dma.hbm_to_vmem [thread:$0]  %s670_s0, 768, %s582_s18, [#allocation3], %s553_s27, %s553_s27, %s554_s28  }
  0x23   :  { %s555_s14 = smov [#allocation7]   ;;  %s501_s19 = scalar_lea.hbm %s672_s2, 768 }
  0x24   :  { %s41_s15 = sshll.u32 %s555_s14, 4  ;;  %p502_p2 = scmp.ne.s32.totalorder %s672_s2, %s501_s19  ;;  %s42_s15 = int_to_ptr.vmem [resolvable:$true] %s41_s15 }
  0x25   :  { %p505_p3 = scmp.lt.u32.totalorder %s501_s19, %s672_s2 }
  0x27   :  { %p507_p4 = pnand %p505_p3, %p502_p2 }
  0x29   :  { %510 = shalt.err (!%p507_p4)
}
  0x2a   :  { %s511_s24 = scalar_lea.vmem %s42_s15, 768  ;;  %p516_p6 = scmp.lt.s32.totalorder %s42_s15, %s42_s15 }
  0x2b   :  { %p512_p5 = scmp.ne.s32.totalorder %s42_s15, %s511_s24  ;;  %p517_p7 = scmp.lt.s32.totalorder %s511_s24, %s511_s24 }
  0x2d   :  { %p518_p8 = por %p517_p7, %p516_p6 }
  0x2f   :  { %p519_p9 = pnand %p518_p8, %p512_p5 }
  0x31   :  { %522 = shalt.err (!%p519_p9)
}
  0x32   :  { %47 = dma.hbm_to_vmem [thread:$0]  %s672_s2, 768, %s42_s15, [#allocation6], %s553_s27, %s553_s27, %s554_s28  }
  0x33   :  { %545 = dma.done.wait [#allocation3], 768  }
  0x34   :  { %546 = vsyncadd [#allocation3], 4294966528 }
  0x35   :  { %547 = dma.done.wait [#allocation6], 1792  }
  0x36   :  { %548 = vsyncadd [#allocation6], 4294965504  ;;  %v65_v0 = vld [vmem:[#allocation5] sm:$0xff]  ;;  %v66_v1 = vld [vmem:[#allocation5 + $0x8] sm:$0xff]  ;;  %vm73_vm0 = vcmask 523264   ;;  %vm200_vm1 = vcmask 392192  }
  0x37   :  { %v67_v2 = vld [vmem:[#allocation5 + $0x10] sm:$0xff]  ;;  %v423_v3 = vpack.c.bf16 %v66_v1, %v65_v0  ;;  %v68_v4 = vld [vmem:[#allocation5 + $0x18] sm:$0xff]  ;;  %v69_v6 = vld [vmem:[#allocation5 + $0x20] sm:$0xff]  ;;  %s556_s26 = smov [#allocation8]  }
  0x38   :  { %v427_v5 = vpack.c.bf16 %v68_v4, %v67_v2  ;;  %v70_v7 = vld [vmem:[#allocation5 + $0x28] sm:$0xff]  ;;  %v59_v8 = vld [vmem:[#allocation2] sm:$0xff]  ;;  %v72_v11 = vld [vmem:[#allocation5 + $0x38] sm:$0xff]  ;;  %s325_s29 = sshll.u32 %s556_s26, 4  ;;  %s326_s29 = int_to_ptr.vmem [resolvable:$true] %s325_s29 }
  0x39   :  { %424 = vmatprep.subr.bf16.mxu0 %v423_v3  ;;  %393 = vmatprep.mubr.msk.f32.mxu0 %vm73_vm0, %v59_v8  ;;  %v431_v9 = vpack.c.bf16 %v70_v7, %v69_v6  ;;  %v71_v10 = vld [vmem:[#allocation5 + $0x30] sm:$0xff]  ;;  %v60_v13 = vld [vmem:[#allocation2 + $0x8] sm:$0xff]  ;;  %v61_v14 = vld [vmem:[#allocation2 + $0x10] sm:$0xff]  ;;  %p528_p11 = scmp.lt.s32.totalorder %s326_s29, %s326_s29 }
  0x3a   :  { %426 = vmatpush3.bf16.msra.mxu0 %v423_v3  ;;  %v435_v12 = vpack.c.bf16 %v72_v11, %v71_v10  ;;  %v62_v15 = vld [vmem:[#allocation2 + $0x18] sm:$0xff]  ;;  %v63_v16 = vld [vmem:[#allocation2 + $0x20] sm:$0xff]  ;;  %v64_v17 = vld [vmem:[#allocation2 + $0x28] sm:$0xff] }
  0x3b   :  { %428 = vmatprep.subr.bf16.mxu0 %v427_v5  ;;  %v187_v18 = vld [vmem:[#allocation7] sm:$0xff]  ;;  %v188_v28 = vld [vmem:[#allocation7 + $0x8] sm:$0xff]  ;;  %v189_v29 = vld [vmem:[#allocation7 + $0x10] sm:$0xff] }
  0x3c   :  { %414 = vmatprep.mubr.msk.f32.mxu1 %vm200_vm1, %v187_v18  ;;  %v190_v30 = vld [vmem:[#allocation7 + $0x18] sm:$0xff]  ;;  %v191_v31 = vld [vmem:[#allocation7 + $0x20] sm:$0xff]  ;;  %v192_v32 = vld [vmem:[#allocation7 + $0x28] sm:$0xff] }
  0x3d   :  { %v344_v33 = vld [vmem:[%s673_s3] ss:$0 sm:$0xff]  ;;  %s523_s3 = scalar_lea.vmem %s326_s29, 768 }
  0x3e   :  { %430 = vmatpush3.bf16.msra.mxu0 %v427_v5  ;;  %p524_p10 = scmp.ne.s32.totalorder %s326_s29, %s523_s3  ;;  %p529_p12 = scmp.lt.s32.totalorder %s523_s3, %s523_s3 }
  0x3f   :  { %432 = vmatprep.subr.bf16.mxu0 %v431_v9 }
  0x40   :  { %p530_p13 = por %p529_p12, %p528_p11 }
  0x42   :  { %434 = vmatpush3.bf16.msra.mxu0 %v431_v9  ;;  %p531_p0 = pnand %p530_p13, %p524_p10 }
  0x43   :  { %436 = vmatprep.subr.bf16.mxu0 %v435_v12 }
  0x46   :  { %438 = vmatpush3.bf16.msra.mxu0 %v435_v12 }
  0x49   :  { %394 = vmatmul.mubr.msk.f32.vlgmr.msra.gmra.mrb[0].mxu0 %vm73_vm0, %v60_v13 }
  0x4a   :  { %396 = vmatprep.mubr.msk.f32.mxu0 %vm73_vm0, %v61_v14 }
  0x4d   :  { %397 = vmatmul.mubr.msk.f32.gmra.mrb[2].mxu0 %vm73_vm0, %v62_v15 }
  0x4e   :  { %399 = vmatprep.mubr.msk.f32.mxu0 %vm73_vm0, %v63_v16 }
  0x51   :  { %400 = vmatmul.mubr.msk.f32.gmra.mrb[4].mxu0 %vm73_vm0, %v64_v17 }
 0x11c   :  { %v395_v19 = vpop.f32.mrb[0].mxu0 }
 0x11d   :  { %v158_v20 = vpop.f32.mrb[1].mxu0 }
 0x11e   :  { %v439_v21 = vpack.c.bf16 %v395_v19, %v158_v20 }
 0x120   :  { %v398_v22 = vpop.f32.mrb[2].mxu0  ;;  %440 = vmatprep.subr.bf16.mxu1 %v439_v21 }
 0x121   :  { %v168_v23 = vpop.f32.mrb[3].mxu0  ;;  %442 = vmatpush3.bf16.msra.mxu1 %v439_v21 }
 0x122   :  { %v443_v24 = vpack.c.bf16 %v398_v22, %v168_v23 }
 0x124   :  { %v401_v25 = vpop.f32.mrb[4].mxu0  ;;  %444 = vmatprep.subr.bf16.mxu1 %v443_v24 }
 0x125   :  { %v178_v26 = vpop.f32.mrb[5].mxu0  ;;  %446 = vmatpush3.bf16.msra.mxu1 %v443_v24 }
 0x126   :  { %v447_v27 = vpack.c.bf16 %v401_v25, %v178_v26 }
 0x128   :  { %448 = vmatprep.subr.bf16.mxu1 %v447_v27 }
 0x129   :  { %450 = vmatpush3.bf16.msra.mxu1 %v447_v27 }
 0x12c   :  { %415 = vmatmul.mubr.msk.f32.vlgmr.msra.gmra.mrb[0].mxu1 %vm200_vm1, %v188_v28 }
 0x12d   :  { %417 = vmatprep.mubr.msk.f32.mxu1 %vm200_vm1, %v189_v29 }
 0x130   :  { %418 = vmatmul.mubr.msk.f32.gmra.mrb[2].mxu1 %vm200_vm1, %v190_v30 }
 0x131   :  { %420 = vmatprep.mubr.msk.f32.mxu1 %vm200_vm1, %v191_v31 }
 0x134   :  { %421 = vmatmul.mubr.msk.f32.gmra.mrb[4].mxu1 %vm200_vm1, %v192_v32 }
 0x1ff   :  { %v416_v34 = vpop.f32.mrb[0].mxu1 }
 0x200   :  { %v291_v35 = vadd.f32 %v416_v34, %v344_v33  ;;  %v285_v36 = vpop.f32.mrb[1].mxu1 }
 0x201   :  { %v286_v37 = vadd.f32 %v344_v33, %v285_v36 }
 0x202   :  { %315 = vst.msk [vmem:[#allocation8 + $0x8] sm:$0xff] %vm73_vm0, %v291_v35 }
 0x203   :  { %314 = vst.msk [vmem:[#allocation8] sm:$0xff] %vm73_vm0, %v286_v37  ;;  %v419_v38 = vpop.f32.mrb[2].mxu1 }
 0x204   :  { %v301_v39 = vadd.f32 %v419_v38, %v344_v33  ;;  %v295_v40 = vpop.f32.mrb[3].mxu1 }
 0x205   :  { %v296_v41 = vadd.f32 %v344_v33, %v295_v40 }
 0x206   :  { %317 = vst.msk [vmem:[#allocation8 + $0x18] sm:$0xff] %vm73_vm0, %v301_v39 }
 0x207   :  { %316 = vst.msk [vmem:[#allocation8 + $0x10] sm:$0xff] %vm73_vm0, %v296_v41  ;;  %v422_v42 = vpop.f32.mrb[4].mxu1 }
 0x208   :  { %v311_v43 = vadd.f32 %v422_v42, %v344_v33  ;;  %v305_v44 = vpop.f32.mrb[5].mxu1 }
 0x209   :  { %v306_v45 = vadd.f32 %v344_v33, %v305_v44 }
 0x20a   :  { %319 = vst.msk [vmem:[#allocation8 + $0x28] sm:$0xff] %vm73_vm0, %v311_v43 }
 0x20b   :  { %318 = vst.msk [vmem:[#allocation8 + $0x20] sm:$0xff] %vm73_vm0, %v306_v45 }
 0x20c   :  { %534 = shalt.err (!%p531_p0)
}
 0x20d   :  { %s535_s6 = scalar_lea.hbm %s674_s4, 768 }
 0x20e   :  { %p536_p1 = scmp.ne.s32.totalorder %s674_s4, %s535_s6  ;;  %p539_p2 = scmp.lt.u32.totalorder %s535_s6, %s674_s4 }
 0x210   :  { %p541_p3 = pnand %p539_p2, %p536_p1 }
 0x212   :  { %544 = shalt.err (!%p541_p3)
}
 0x213   :  { %331 = dma.vmem_to_hbm [thread:$0]  %s326_s29, 768, %s674_s4, [#allocation4], %s553_s27, %s553_s27, %s554_s28  }
 0x214   :  { %549 = dma.done.wait [#allocation4], 768  }
 0x215   :  { %550 = vsyncadd [#allocation4], 4294966528 }
 0x216   :  { %335 = vsyncpa [#allocation3], 1 }
 0x217   :  { %336 = vsyncpa [#allocation6], 1 }
 0x218   :  { %337 = vsyncpa [#allocation4], 1 }

</bundles_post_ra>
